<compile_context>
chip_gen: v6e
topology: v6e:2x2x1
jax: 0.10.0
libtpu: 0.0.40
codegen_flags: <defaults>
</compile_context>

<pallas_src>
import functools
import math

import jax
import jax.numpy as jnp
from jax import lax
from jax.experimental import pallas as pl
from jax.experimental.pallas import tpu as pltpu


def _patch_embed_kernel(x_ref, w_ref, b_ref, g_ref, be_ref, st_ref, o_ref, *,
                        inv_e, eps, use_norm):
    """One row tile: packed-patch matmul + bias (+ per-pixel LayerNorm)."""
    # x_ref : (tm, k*K)   k patch-pixels packed per row
    # w_ref : (k*K, k*E)  block-diagonal projection weight
    # b_ref : (1, k*E)    conv bias, tiled k times
    # g_ref : (1, k*E)    LayerNorm gamma, tiled k times
    # be_ref: (1, k*E)    LayerNorm beta, tiled k times
    # st_ref: (k, k*E)    per-pixel segment indicator (row j hot on pixel j's lanes)
    # o_ref : (tm, k*E)   lane-dense output tile (k*E is a multiple of 128)
    y = jnp.dot(x_ref[...], w_ref[...], preferred_element_type=jnp.float32)
    y = y + b_ref[...].astype(jnp.float32)
    if use_norm:
        st = st_ref[...]
        # Per-pixel mean via a lane-lane contraction (A @ B^T form on the MXU).
        mean = lax.dot_general(y, st, (((1,), (1,)), ((), ())),
                               preferred_element_type=jnp.float32) * inv_e
        mean_b = jnp.dot(mean, st, preferred_element_type=jnp.float32)
        d = y - mean_b
        # Two-pass variance (numerically safe when |mean| >> std).
        var = lax.dot_general(d * d, st, (((1,), (1,)), ((), ())),
                              preferred_element_type=jnp.float32) * inv_e
        rstd_b = jnp.dot(lax.rsqrt(var + eps), st,
                         preferred_element_type=jnp.float32)
        y = d * rstd_b * g_ref[...].astype(jnp.float32) \
            + be_ref[...].astype(jnp.float32)
    o_ref[...] = y.astype(o_ref.dtype)


def _vmem_capacity_bytes():
    try:
        info = pltpu.get_tpu_info()
        cap = getattr(info, "vmem_capacity_bytes", None)
        if cap:
            return int(cap)
    except Exception:
        pass
    return 64 * 1024 * 1024       # conservative: v7x per-TensorCore VMEM


def _derive_row_tile(n_rows, row_in, row_out, itemsize, big_vmem):
    """Packed-row tile: VMEM-budget derived, multiple of 8, but small enough
    that the 1-D grid keeps >= ~8 steps (>= ~4 per TensorCore on 2-TC chips)
    so every core still overlaps its DMA with compute."""
    if n_rows <= 8:
        return max(n_rows, 1)
    budget, cap = (28 * 2**20, 2048) if big_vmem else (10 * 2**20, 1024)
    tm = budget // max(2 * (row_in + row_out) * itemsize, 1)
    tm = int(min(max(tm, 8), cap))
    tm -= tm % 8
    if n_rows >= 64:                      # enough rows: insist on ~8 grid steps
        per = -(-n_rows // 8)
        per += (-per) % 8
        tm = min(tm, per)
    max_tile = (n_rows // 8) * 8          # block never larger than the array
    return max(8, min(tm, max_tile))


def patch_embed(x, w_conv, b_conv, gamma=None, beta=None, *,
                patch_size=4, eps=1e-5):
    """
    x:      (B, C, H, W)        NCHW input (PyTorch layout)
    w_conv: (E, C, p, p)        Conv2d weight (kernel == stride == p)
    b_conv: (E,)                Conv2d bias
    gamma, beta: (E,) or None   LayerNorm params (None -> Identity, the default)
    returns (B, H//p, W//p, E)  channel-last patch embeddings
    """
    B, C, H, W = x.shape
    p = patch_size
    assert H % p == 0 and W % p == 0, "image size must be divisible by patch"
    E = int(w_conv.shape[0])
    Hp, Wp = H // p, W // p
    N = B * Hp * Wp
    K = C * p * p
    use_norm = gamma is not None
    itemsize = jnp.dtype(x.dtype).itemsize

    # --- Patch extraction (one XLA transpose; no pad, no extra copies) ---
    # TODO(synk): this is the one remaining input-sized HBM round trip; the
    # NCHW -> (N, C*p*p) gather has lane-stride-p structure that is not
    # expressible as a rectangular BlockSpec, and the in-kernel strided-slice
    # reorder was left out to keep Mosaic lowering robust.
    patches = (x.reshape(B, C, Hp, p, Wp, p)
                 .transpose(0, 2, 4, 1, 3, 5)
                 .reshape(N, K))

    # --- Lane-dense packing: k patch-pixels per kernel row so the stored last
    # dim k*E is a multiple of 128 (no masked vst).  Free row-major reshape;
    # if k does not divide N we fall back to k=1 instead of padding. ---
    k = 128 // math.gcd(E, 128)
    if N % k:
        k = 1
    kK, kE = k * K, k * E
    n_packed = N // k
    x_packed = patches.reshape(n_packed, kK)

    big_vmem = _vmem_capacity_bytes() >= 100 * 2**20
    tm = _derive_row_tile(n_packed, kK, kE, itemsize, big_vmem)
    n_blocks = pl.cdiv(n_packed, tm)     # ragged final block: Pallas masks it

    # Block-diagonal weight realizes the packing with plain MXU work (no
    # in-register relayout); bias / gamma / beta / indicator tiled to match.
    # NOTE (v6e/v7x): the kron inflates MXU FLOPs by k and the weight by k^2;
    # fine while memory-bound, re-derive the binding unit for small E / int8.
    w_k = w_conv.reshape(E, K).T                            # (K, E), in x out
    w_big = jnp.kron(jnp.eye(k, dtype=w_k.dtype), w_k)      # (kK, kE)
    b_big = jnp.tile(b_conv, k).reshape(1, kE)
    if use_norm:
        g_big = jnp.tile(gamma, k).reshape(1, kE)
        be_big = jnp.tile(beta, k).reshape(1, kE)
    else:
        g_big = jnp.ones((1, kE), jnp.float32)
        be_big = jnp.zeros((1, kE), jnp.float32)
    seg_t = jnp.kron(jnp.eye(k, dtype=jnp.float32),
                     jnp.ones((1, E), jnp.float32))          # (k, kE)

    # Generation-aware VMEM limit (96 MiB on 128-MiB parts, 48 MiB on v7x).
    const_bytes = (kK * kE + 3 * kE + k * kE) * itemsize
    need = 2 * tm * (kK + kE) * itemsize + 2 * const_bytes   # double-buffered
    limit_cap = (96 if big_vmem else 48) * 2**20
    vmem_limit = int(min(limit_cap, max(32 * 2**20, 2 * need)))

    # Cost hint for XLA's scheduler (packing inflates MXU flops by k; LN adds
    # four thin matmuls and one rsqrt per patch).
    flops = 2 * n_packed * kK * kE + (8 * n_packed * kE * k if use_norm else 0)
    cost = pl.CostEstimate(
        flops=int(flops),
        transcendentals=int(n_packed * k if use_norm else 0),
        bytes_accessed=int(n_packed * (kK + kE) * itemsize + const_bytes),
    )

    kernel = functools.partial(_patch_embed_kernel, inv_e=1.0 / E, eps=eps,
                               use_norm=use_norm)

    y_packed = pl.pallas_call(
        kernel,
        out_shape=jax.ShapeDtypeStruct((n_packed, kE), x.dtype),
        grid_spec=pltpu.PrefetchScalarGridSpec(
            num_scalar_prefetch=0,
            grid=(n_blocks,),
            in_specs=[
                pl.BlockSpec((tm, kK), lambda i: (i, 0)),    # packed patch rows
                pl.BlockSpec((kK, kE), lambda i: (0, 0)),    # block-diag weight
                pl.BlockSpec((1, kE), lambda i: (0, 0)),     # bias
                pl.BlockSpec((1, kE), lambda i: (0, 0)),     # gamma
                pl.BlockSpec((1, kE), lambda i: (0, 0)),     # beta
                pl.BlockSpec((k, kE), lambda i: (0, 0)),     # segment indicator^T
            ],
            out_specs=pl.BlockSpec((tm, kE), lambda i: (i, 0)),
        ),
        compiler_params=pltpu.CompilerParams(
            dimension_semantics=("parallel",),
            vmem_limit_bytes=vmem_limit,
        ),
        cost_estimate=cost,
    )(x_packed, w_big, b_big, g_big, be_big, seg_t)

    # Unpack with free row-major reshapes only (no slice, no extra HBM pass).
    return y_packed.reshape(N, E).reshape(B, Hp, Wp, E)


def _reference(x, w_conv, b_conv, gamma, beta, patch_size, eps, use_norm):
    p = patch_size
    y = lax.conv_general_dilated(
        x, w_conv, window_strides=(p, p), padding="VALID",
        dimension_numbers=("NCHW", "OIHW", "NCHW"),
        precision=lax.Precision.HIGHEST)
    y = y + b_conv.reshape(1, -1, 1, 1)
    y = jnp.transpose(y, (0, 2, 3, 1))
    if use_norm:
        mean = jnp.mean(y, axis=-1, keepdims=True)
        var = jnp.mean((y - mean) ** 2, axis=-1, keepdims=True)
        y = (y - mean) / jnp.sqrt(var + eps) * gamma + beta
    return y


if __name__ == "__main__":
    # Small synthetic config consistent with the module:
    # in_chans=3, patch_size=4, embed_dim=96, img_size=32, batch=2
    B, C, H, W = 2, 3, 32, 32
    p, E = 4, 96

    key = jax.random.PRNGKey(0)
    kx, kw, kb, kg, kbe = jax.random.split(key, 5)
    x = jax.random.normal(kx, (B, C, H, W), dtype=jnp.float32)

    fan_in = C * p * p
    bound = 1.0 / math.sqrt(fan_in)
    w_conv = jax.random.uniform(kw, (E, C, p, p), jnp.float32, -bound, bound)
    b_conv = jax.random.uniform(kb, (E,), jnp.float32, -bound, bound)
    gamma = 1.0 + 0.02 * jax.random.normal(kg, (E,), jnp.float32)
    beta = 0.02 * jax.random.normal(kbe, (E,), jnp.float32)

    pe = jax.jit(functools.partial(patch_embed, patch_size=p))

    # norm_layer = nn.LayerNorm path
    out = jax.block_until_ready(pe(x, w_conv, b_conv, gamma, beta))
    ref = _reference(x, w_conv, b_conv, gamma, beta, p, 1e-5, True)
    assert out.shape == (B, H // p, W // p, E)
    assert jnp.allclose(out, ref, atol=1e-3, rtol=1e-3), float(
        jnp.max(jnp.abs(out - ref)))

    # default path: norm_layer = None -> Identity
    out_id = jax.block_until_ready(pe(x, w_conv, b_conv, None, None))
    ref_id = _reference(x, w_conv, b_conv, None, None, p, 1e-5, False)
    assert jnp.allclose(out_id, ref_id, atol=1e-3, rtol=1e-3), float(
        jnp.max(jnp.abs(out_id - ref_id)))

    print("KERNEL_OK")
</pallas_src>

<mosaic_0001>
module attributes {stable_mosaic.version = 11 : i64} {
  func.func @_patch_embed_kernel(%arg0: i32, %arg1: memref<32x192xf32, #tpu.memory_space<vmem>>, %arg2: memref<192x384xf32, #tpu.memory_space<vmem>>, %arg3: memref<1x384xf32, #tpu.memory_space<vmem>>, %arg4: memref<1x384xf32, #tpu.memory_space<vmem>>, %arg5: memref<1x384xf32, #tpu.memory_space<vmem>>, %arg6: memref<4x384xf32, #tpu.memory_space<vmem>>, %arg7: memref<32x384xf32, #tpu.memory_space<vmem>>) attributes {dimension_semantics = [#tpu.dimension_semantics<parallel>], iteration_bounds = array<i64: 1>, scalar_prefetch = 0 : i64, scratch_operands = 0 : i64, tpu.core_type = #tpu.core_type<tc>, window_params = [{transform_indices = @transform_0, window_bounds = array<i64: 32, 192>}, {pipeline_mode = #tpu.pipeline_mode<synchronous>, transform_indices = @transform_1, window_bounds = array<i64: 192, 384>}, {pipeline_mode = #tpu.pipeline_mode<synchronous>, transform_indices = @transform_2, window_bounds = array<i64: 1, 384>}, {pipeline_mode = #tpu.pipeline_mode<synchronous>, transform_indices = @transform_3, window_bounds = array<i64: 1, 384>}, {pipeline_mode = #tpu.pipeline_mode<synchronous>, transform_indices = @transform_4, window_bounds = array<i64: 1, 384>}, {pipeline_mode = #tpu.pipeline_mode<synchronous>, transform_indices = @transform_5, window_bounds = array<i64: 4, 384>}, {transform_indices = @transform_6, window_bounds = array<i64: 32, 384>}]} {
    %c0 = arith.constant 0 : index
    %c0_0 = arith.constant 0 : index
    %0 = vector.load %arg1[%c0, %c0_0] : memref<32x192xf32, #tpu.memory_space<vmem>>, vector<32x192xf32>
    %c0_1 = arith.constant 0 : index
    %c0_2 = arith.constant 0 : index
    %1 = vector.load %arg2[%c0_1, %c0_2] : memref<192x384xf32, #tpu.memory_space<vmem>>, vector<192x384xf32>
    %cst = arith.constant dense<0.000000e+00> : vector<32x384xf32>
    %2 = tpu.matmul %0, %1, %cst {dimension_numbers = #tpu.dot_dimension_numbers<[1], [0], [0], [1], [0, 0, 1, 1], [], []>} : vector<32x192xf32>, vector<192x384xf32>, vector<32x384xf32> -> vector<32x384xf32>
    %c0_3 = arith.constant 0 : index
    %c0_4 = arith.constant 0 : index
    %3 = vector.load %arg3[%c0_3, %c0_4] : memref<1x384xf32, #tpu.memory_space<vmem>>, vector<1x384xf32>
    %4 = vector.broadcast %3 : vector<1x384xf32> to vector<32x384xf32>
    %5 = arith.addf %2, %4 : vector<32x384xf32>
    %c0_5 = arith.constant 0 : index
    %c0_6 = arith.constant 0 : index
    %6 = vector.load %arg6[%c0_5, %c0_6] : memref<4x384xf32, #tpu.memory_space<vmem>>, vector<4x384xf32>
    %cst_7 = arith.constant dense<0.000000e+00> : vector<32x4xf32>
    %7 = tpu.matmul %5, %6, %cst_7 {dimension_numbers = #tpu.dot_dimension_numbers<[1], [1], [0], [0], [0, 0, 1, 0], [], []>} : vector<32x384xf32>, vector<4x384xf32>, vector<32x4xf32> -> vector<32x4xf32>
    %cst_8 = arith.constant 0.010416667 : f32
    %8 = vector.broadcast %cst_8 : f32 to vector<32x4xf32>
    %9 = arith.mulf %7, %8 : vector<32x4xf32>
    %cst_9 = arith.constant dense<0.000000e+00> : vector<32x384xf32>
    %10 = tpu.matmul %9, %6, %cst_9 {dimension_numbers = #tpu.dot_dimension_numbers<[1], [0], [0], [1], [0, 0, 1, 1], [], []>} : vector<32x4xf32>, vector<4x384xf32>, vector<32x384xf32> -> vector<32x384xf32>
    %11 = arith.subf %5, %10 : vector<32x384xf32>
    %12 = arith.mulf %11, %11 : vector<32x384xf32>
    %cst_10 = arith.constant dense<0.000000e+00> : vector<32x4xf32>
    %13 = tpu.matmul %12, %6, %cst_10 {dimension_numbers = #tpu.dot_dimension_numbers<[1], [1], [0], [0], [0, 0, 1, 0], [], []>} : vector<32x384xf32>, vector<4x384xf32>, vector<32x4xf32> -> vector<32x4xf32>
    %cst_11 = arith.constant 0.010416667 : f32
    %14 = vector.broadcast %cst_11 : f32 to vector<32x4xf32>
    %15 = arith.mulf %13, %14 : vector<32x4xf32>
    %cst_12 = arith.constant 9.99999974E-6 : f32
    %16 = vector.broadcast %cst_12 : f32 to vector<32x4xf32>
    %17 = arith.addf %15, %16 : vector<32x4xf32>
    %18 = math.rsqrt %17 : vector<32x4xf32>
    %cst_13 = arith.constant dense<0.000000e+00> : vector<32x384xf32>
    %19 = tpu.matmul %18, %6, %cst_13 {dimension_numbers = #tpu.dot_dimension_numbers<[1], [0], [0], [1], [0, 0, 1, 1], [], []>} : vector<32x4xf32>, vector<4x384xf32>, vector<32x384xf32> -> vector<32x384xf32>
    %20 = arith.mulf %11, %19 : vector<32x384xf32>
    %c0_14 = arith.constant 0 : index
    %c0_15 = arith.constant 0 : index
    %21 = vector.load %arg4[%c0_14, %c0_15] : memref<1x384xf32, #tpu.memory_space<vmem>>, vector<1x384xf32>
    %22 = vector.broadcast %21 : vector<1x384xf32> to vector<32x384xf32>
    %23 = arith.mulf %20, %22 : vector<32x384xf32>
    %c0_16 = arith.constant 0 : index
    %c0_17 = arith.constant 0 : index
    %24 = vector.load %arg5[%c0_16, %c0_17] : memref<1x384xf32, #tpu.memory_space<vmem>>, vector<1x384xf32>
    %25 = vector.broadcast %24 : vector<1x384xf32> to vector<32x384xf32>
    %26 = arith.addf %23, %25 : vector<32x384xf32>
    %c0_18 = arith.constant 0 : index
    %c0_19 = arith.constant 0 : index
    %27 = vector.load %arg7[%c0_18, %c0_19] : memref<32x384xf32, #tpu.memory_space<vmem>>, vector<32x384xf32>
    tpu.vector_store %arg7[%c0_18, %c0_19], %26 {strides = array<i32>} : memref<32x384xf32, #tpu.memory_space<vmem>>, vector<32x384xf32>,
    return
  }
  func.func @transform_0(%arg0: i32) -> (i32, i32) {
    %c0_i32 = arith.constant 0 : i32
    %c0_i32_0 = arith.constant 0 : i32
    return %arg0, %c0_i32 : i32, i32
  }
  func.func @transform_1(%arg0: i32) -> (i32, i32) {
    %c0_i32 = arith.constant 0 : i32
    %c0_i32_0 = arith.constant 0 : i32
    %c0_i32_1 = arith.constant 0 : i32
    return %c0_i32, %c0_i32_0 : i32, i32
  }
  func.func @transform_2(%arg0: i32) -> (i32, i32) {
    %c0_i32 = arith.constant 0 : i32
    %c0_i32_0 = arith.constant 0 : i32
    %c0_i32_1 = arith.constant 0 : i32
    return %c0_i32, %c0_i32_0 : i32, i32
  }
  func.func @transform_3(%arg0: i32) -> (i32, i32) {
    %c0_i32 = arith.constant 0 : i32
    %c0_i32_0 = arith.constant 0 : i32
    %c0_i32_1 = arith.constant 0 : i32
    return %c0_i32, %c0_i32_0 : i32, i32
  }
  func.func @transform_4(%arg0: i32) -> (i32, i32) {
    %c0_i32 = arith.constant 0 : i32
    %c0_i32_0 = arith.constant 0 : i32
    %c0_i32_1 = arith.constant 0 : i32
    return %c0_i32, %c0_i32_0 : i32, i32
  }
  func.func @transform_5(%arg0: i32) -> (i32, i32) {
    %c0_i32 = arith.constant 0 : i32
    %c0_i32_0 = arith.constant 0 : i32
    %c0_i32_1 = arith.constant 0 : i32
    return %c0_i32, %c0_i32_0 : i32, i32
  }
  func.func @transform_6(%arg0: i32) -> (i32, i32) {
    %c0_i32 = arith.constant 0 : i32
    %c0_i32_0 = arith.constant 0 : i32
    return %arg0, %c0_i32 : i32, i32
  }
}

</mosaic_0001>

<bundles_post_ra>
// kernel: tile.18
= control target key start
LH: loop header
LB: loop body
LE: loop exit
PB: predicated region body
PF: predicated region fallthrough
CT: control target
= control target key end

     0   :  { %s22_s0 = inlined_call_operand.vmem [shape: f32[96], index: 0, kind: input, shape index: {}]   ;;  %s23_s1 = inlined_call_operand.vmem [shape: f32[4,96], index: 1, kind: output, shape index: {}]  }
   0x1   :  { %v4_v0 = vld [vmem:[%s22_s0] ss:$0 sm:$0xff] }
   0x2   :  { %5 = vst [vmem:[%s23_s1] sm:$0xf] %v4_v0 }

// kernel: tile.19
= control target key start
LH: loop header
LB: loop body
LE: loop exit
PB: predicated region body
PF: predicated region fallthrough
CT: control target
= control target key end

     0   :  { %vm14_vm0 = vcmask 261120   ;;  %vm18_vm1 = vcmask 523264   ;;  %vm8_vm2 = vcmask 785408   ;;  %s72_s8 = smov 32   ;;  %s73_s9 = smov 64   ;;  %vm21_vm3 = vcmask 1048320   ;;  %s100_s0 = inlined_call_operand.vmem [shape: f32[4,96], index: 0, kind: input, shape index: {}]   ;;  %s101_s1 = inlined_call_operand.vmem [shape: f32[1,384], index: 1, kind: output, shape index: {}]  }
   0x1   :  { %v5_v0 = vld [vmem:[%s100_s0] sm:$0xf]  ;;  %s71_s0 = smov 96   ;;  %vm34_vm4 = vcmask 1048064   ;;  %vm41_vm5 = vcmask 1047808  }
   0x2   :  { %6 = vst [vmem:[#allocation1] sm:$0xf] %v5_v0 }
   0x9   :  { %v11_v1 = vld [vmem:[#allocation1 + $0x1] sm:$0x1]   ;;  %v24_v3 = vld [vmem:[#allocation1 + $0x2] sm:$0x1]   ;;  %v38_v6 = vld [vmem:[#allocation1 + $0x3] sm:$0x1]  }
   0xa   :  { %v13_v2 = vld [vmem:[#allocation1 + $0x1] sm:$0x1]   ;;  %v26_v5 = vld [vmem:[#allocation1 + $0x2] sm:$0x1]   ;;  %v7_v7 = vld [vmem:[#allocation1] sm:$0x1]   ;;  %39 = vrot.lane.b32.xlu1 %v38_v6, %s72_s8 }
   0xb   :  { %v15_v4 = vsel %vm14_vm0, %v13_v2, %v11_v1  ;;  %9 = vst.msk [vmem:[#allocation0] sm:$0x1] %vm8_vm2, %v7_v7   ;;  %v28_v8 = vsel %vm18_vm1, %v26_v5, %v24_v3 }
   0xc   :  { %16 = vrot.lane.b32.xlu0 %v15_v4, %s71_s0 }
  0x10   :  { %29 = vrot.lane.b32.xlu0 %v28_v8, %s73_s9 }
  0x7c   :  { %v40_v10 = vpop.permute.xlu1 %39  }
  0x7e   :  { %v17_v9 = vpop.permute.xlu0 %16  }
  0x7f   :  { %20 = vst.msk [vmem:[#allocation0 + $0x8] sm:$0x1] %vm18_vm1, %v17_v9  }
  0x80   :  { %22 = vst.msk [vmem:[#allocation0] sm:$0x1] %vm21_vm3, %v17_v9  }
  0x82   :  { %v30_v11 = vpop.permute.xlu0 %29  }
  0x83   :  { %33 = vst.msk [vmem:[#allocation0 + $0x10] sm:$0x1] %vm14_vm0, %v30_v11  }
  0x84   :  { %36 = vst.msk [vmem:[#allocation0 + $0x8] sm:$0x1] %vm34_vm4, %v30_v11  }
  0x85   :  { %43 = vst.msk [vmem:[#allocation0 + $0x10] sm:$0x1] %vm41_vm5, %v40_v10  }
  0x87   :  { %v48_v12 = vld [vmem:[#allocation0] sm:$0x1] }
  0x88   :  { %51 = vst [vmem:[%s101_s1] sm:$0x1] %v48_v12 }
  0x8b   :  { %v53_v13 = vld [vmem:[#allocation0 + $0x8] sm:$0x1] }
  0x8c   :  { %66 = vst [vmem:[%s101_s1 + $0x1] sm:$0x1] %v53_v13  ;;  %v59_v14 = vld [vmem:[#allocation0 + $0x10] sm:$0x1] }
  0x8d   :  { %67 = vst [vmem:[%s101_s1 + $0x2] sm:$0x1] %v59_v14 }

// kernel: patch_embed.1
= control target key start
LH: loop header
LB: loop body
LE: loop exit
PB: predicated region body
PF: predicated region fallthrough
CT: control target
= control target key end

     0   :  { %v1251_v0 = vmov 0.0   ;;  %vm120_vm0 = vcmask 523264   ;;  %vm500_vm1 = vcmask 1043456   ;;  %vm487_vm2 = vcmask 31744   ;;  %s1789_s1 = inlined_call_operand.vmem [shape: f32[192,384], index: 1, kind: input, shape index: {}]   ;;  %s1790_s5 = inlined_call_operand.vmem [shape: f32[4,384], index: 5, kind: input, shape index: {}]   ;;  %s1791_s0 = inlined_call_operand.vmem [shape: f32[32,192], index: 0, kind: input, shape index: {}]   ;;  %s1792_s2 = inlined_call_operand.vmem [shape: f32[1,384], index: 2, kind: input, shape index: {}]   ;;  %s1793_s3 = inlined_call_operand.vmem [shape: f32[1,384], index: 3, kind: input, shape index: {}]   ;;  %s1794_s4 = inlined_call_operand.vmem [shape: f32[1,384], index: 4, kind: input, shape index: {}]   ;;  %s1795_s6 = inlined_call_operand.vmem [shape: f32[32,384], index: 6, kind: output, shape index: {}]  }
   0x1   :  { %222 = vmatprep.subr.mxu1 %v1251_v0  ;;  %v77_v1 = vld [vmem:[%s1789_s1 + $0x170] sm:$0xff]  ;;  %v78_v2 = vld [vmem:[%s1789_s1 + $0x178] sm:$0xff]  ;;  %v76_v3 = vld [vmem:[%s1789_s1 + $0x168] sm:$0xff] }
   0x2   :  { %133 = vmatprep.subr.mxu0 %v77_v1  ;;  %223 = vmatpush1.msra.mxu1 %v78_v2  ;;  %v74_v4 = vld [vmem:[%s1789_s1 + $0x158] sm:$0xff]  ;;  %v75_v5 = vld [vmem:[%s1789_s1 + $0x160] sm:$0xff]  ;;  %v73_v6 = vld [vmem:[%s1789_s1 + $0x150] sm:$0xff] }
   0x3   :  { %134 = vmatpush1.msra.mxu0 %v76_v3  ;;  %224 = vmatprep.subr.mxu1 %v1251_v0  ;;  %v71_v7 = vld [vmem:[%s1789_s1 + $0x140] sm:$0xff]  ;;  %v72_v8 = vld [vmem:[%s1789_s1 + $0x148] sm:$0xff]  ;;  %v70_v9 = vld [vmem:[%s1789_s1 + $0x138] sm:$0xff] }
   0x4   :  { %135 = vmatprep.subr.mxu0 %v74_v4  ;;  %225 = vmatpush1.msra.mxu1 %v75_v5  ;;  %v68_v10 = vld [vmem:[%s1789_s1 + $0x128] sm:$0xff]  ;;  %v69_v11 = vld [vmem:[%s1789_s1 + $0x130] sm:$0xff]  ;;  %v67_v12 = vld [vmem:[%s1789_s1 + $0x120] sm:$0xff] }
   0x5   :  { %136 = vmatpush1.msra.mxu0 %v73_v6  ;;  %226 = vmatprep.subr.mxu1 %v1251_v0  ;;  %v65_v13 = vld [vmem:[%s1789_s1 + $0x110] sm:$0xff]  ;;  %v66_v14 = vld [vmem:[%s1789_s1 + $0x118] sm:$0xff]  ;;  %v64_v15 = vld [vmem:[%s1789_s1 + $0x108] sm:$0xff] }
   0x6   :  { %137 = vmatprep.subr.mxu0 %v71_v7  ;;  %227 = vmatpush1.msra.mxu1 %v72_v8  ;;  %v62_v16 = vld [vmem:[%s1789_s1 + $0xf8] sm:$0xff]  ;;  %v63_v17 = vld [vmem:[%s1789_s1 + $0x100] sm:$0xff]  ;;  %v61_v18 = vld [vmem:[%s1789_s1 + $0xf0] sm:$0xff] }
   0x7   :  { %138 = vmatpush1.msra.mxu0 %v70_v9  ;;  %228 = vmatprep.subr.mxu1 %v1251_v0  ;;  %v59_v19 = vld [vmem:[%s1789_s1 + $0xe0] sm:$0xff]  ;;  %v60_v20 = vld [vmem:[%s1789_s1 + $0xe8] sm:$0xff]  ;;  %v58_v21 = vld [vmem:[%s1789_s1 + $0xd8] sm:$0xff] }
   0x8   :  { %139 = vmatprep.subr.mxu0 %v68_v10  ;;  %229 = vmatpush1.msra.mxu1 %v69_v11  ;;  %v56_v22 = vld [vmem:[%s1789_s1 + $0xc8] sm:$0xff]  ;;  %v57_v23 = vld [vmem:[%s1789_s1 + $0xd0] sm:$0xff]  ;;  %v55_v24 = vld [vmem:[%s1789_s1 + $0xc0] sm:$0xff] }
   0x9   :  { %140 = vmatpush1.msra.mxu0 %v67_v12  ;;  %230 = vmatprep.subr.mxu1 %v1251_v0  ;;  %v53_v25 = vld [vmem:[%s1789_s1 + $0xb0] sm:$0xff]  ;;  %v54_v26 = vld [vmem:[%s1789_s1 + $0xb8] sm:$0xff]  ;;  %v52_v27 = vld [vmem:[%s1789_s1 + $0xa8] sm:$0xff] }
   0xa   :  { %141 = vmatprep.subr.mxu0 %v65_v13  ;;  %231 = vmatpush1.msra.mxu1 %v66_v14  ;;  %v50_v28 = vld [vmem:[%s1789_s1 + $0x98] sm:$0xff]  ;;  %v51_v29 = vld [vmem:[%s1789_s1 + $0xa0] sm:$0xff]  ;;  %v49_v30 = vld [vmem:[%s1789_s1 + $0x90] sm:$0xff] }
   0xb   :  { %142 = vmatpush1.msra.mxu0 %v64_v15  ;;  %232 = vmatprep.subr.mxu1 %v1251_v0  ;;  %v47_v31 = vld [vmem:[%s1789_s1 + $0x80] sm:$0xff]  ;;  %v48_v32 = vld [vmem:[%s1789_s1 + $0x88] sm:$0xff]  ;;  %v46_v33 = vld [vmem:[%s1789_s1 + $0x78] sm:$0xff] }
   0xc   :  { %143 = vmatprep.subr.mxu0 %v62_v16  ;;  %233 = vmatpush1.msra.mxu1 %v63_v17  ;;  %v44_v34 = vld [vmem:[%s1789_s1 + $0x68] sm:$0xff]  ;;  %v45_v35 = vld [vmem:[%s1789_s1 + $0x70] sm:$0xff]  ;;  %v43_v36 = vld [vmem:[%s1789_s1 + $0x60] sm:$0xff] }
   0xd   :  { %144 = vmatpush1.msra.mxu0 %v61_v18  ;;  %234 = vmatprep.subr.mxu1 %v1251_v0  ;;  %v41_v37 = vld [vmem:[%s1789_s1 + $0x50] sm:$0xff]  ;;  %v42_v38 = vld [vmem:[%s1789_s1 + $0x58] sm:$0xff]  ;;  %v40_v39 = vld [vmem:[%s1789_s1 + $0x48] sm:$0xff] }
   0xe   :  { %145 = vmatprep.subr.mxu0 %v59_v19  ;;  %235 = vmatpush1.msra.mxu1 %v60_v20  ;;  %v38_v40 = vld [vmem:[%s1789_s1 + $0x38] sm:$0xff]  ;;  %v39_v41 = vld [vmem:[%s1789_s1 + $0x40] sm:$0xff]  ;;  %v37_v42 = vld [vmem:[%s1789_s1 + $0x30] sm:$0xff] }
   0xf   :  { %146 = vmatpush1.msra.mxu0 %v58_v21  ;;  %236 = vmatprep.subr.mxu1 %v1251_v0  ;;  %v35_v43 = vld [vmem:[%s1789_s1 + $0x20] sm:$0xff]  ;;  %v36_v44 = vld [vmem:[%s1789_s1 + $0x28] sm:$0xff]  ;;  %v34_v45 = vld [vmem:[%s1789_s1 + $0x18] sm:$0xff]  ;;  %v105_v21 = vlaneseq }
  0x10   :  { %147 = vmatprep.subr.mxu0 %v56_v22  ;;  %237 = vmatpush1.msra.mxu1 %v57_v23  ;;  %v32_v46 = vld [vmem:[%s1789_s1 + $0x8] sm:$0xff]  ;;  %v33_v47 = vld [vmem:[%s1789_s1 + $0x10] sm:$0xff]  ;;  %v31_v48 = vld [vmem:[%s1789_s1] sm:$0xff] }
  0x11   :  { %148 = vmatpush1.msra.mxu0 %v55_v24  ;;  %238 = vmatprep.subr.mxu1 %v1251_v0  ;;  %v101_v49 = vld [vmem:[%s1789_s1 + $0x230] sm:$0xff]  ;;  %v102_v50 = vld [vmem:[%s1789_s1 + $0x238] sm:$0xff]  ;;  %v100_v51 = vld [vmem:[%s1789_s1 + $0x228] sm:$0xff]  ;;  %v106_v22 = vshrl.u32 %v105_v21, 7 }
  0x12   :  { %149 = vmatprep.subr.mxu0 %v53_v25  ;;  %239 = vmatpush1.msra.mxu1 %v54_v26  ;;  %v98_v52 = vld [vmem:[%s1789_s1 + $0x218] sm:$0xff]  ;;  %v99_v53 = vld [vmem:[%s1789_s1 + $0x220] sm:$0xff]  ;;  %v97_v54 = vld [vmem:[%s1789_s1 + $0x210] sm:$0xff] }
  0x13   :  { %150 = vmatpush1.msra.mxu0 %v52_v27  ;;  %240 = vmatprep.subr.mxu1 %v1251_v0  ;;  %v95_v55 = vld [vmem:[%s1789_s1 + $0x200] sm:$0xff]  ;;  %v96_v56 = vld [vmem:[%s1789_s1 + $0x208] sm:$0xff]  ;;  %v94_v57 = vld [vmem:[%s1789_s1 + $0x1f8] sm:$0xff]  ;;  %v1581_v23 = vsub.s32 2, %v106_v22  ;;  %v1586_v25 = vsub.s32 1, %v106_v22  ;;  %v1589_v27 = vsub.s32 0, %v106_v22 }
  0x14   :  { %151 = vmatprep.subr.mxu0 %v50_v28  ;;  %241 = vmatpush1.msra.mxu1 %v51_v29  ;;  %v92_v58 = vld [vmem:[%s1789_s1 + $0x1e8] sm:$0xff]  ;;  %v93_v59 = vld [vmem:[%s1789_s1 + $0x1f0] sm:$0xff]  ;;  %v91_v60 = vld [vmem:[%s1789_s1 + $0x1e0] sm:$0xff] }
  0x15   :  { %152 = vmatpush1.msra.mxu0 %v49_v30  ;;  %242 = vmatprep.subr.mxu1 %v1251_v0  ;;  %v89_v61 = vld [vmem:[%s1789_s1 + $0x1d0] sm:$0xff]  ;;  %v90_v62 = vld [vmem:[%s1789_s1 + $0x1d8] sm:$0xff]  ;;  %v88_v63 = vld [vmem:[%s1789_s1 + $0x1c8] sm:$0xff] }
  0x16   :  { %153 = vmatprep.subr.mxu0 %v47_v31  ;;  %243 = vmatpush1.msra.mxu1 %v48_v32  ;;  %v86_v1 = vld [vmem:[%s1789_s1 + $0x1b8] sm:$0xff]  ;;  %v87_v2 = vld [vmem:[%s1789_s1 + $0x1c0] sm:$0xff]  ;;  %v85_v3 = vld [vmem:[%s1789_s1 + $0x1b0] sm:$0xff] }
  0x17   :  { %154 = vmatpush1.msra.mxu0 %v46_v33  ;;  %244 = vmatprep.subr.mxu1 %v1251_v0  ;;  %v83_v4 = vld [vmem:[%s1789_s1 + $0x1a0] sm:$0xff]  ;;  %v84_v5 = vld [vmem:[%s1789_s1 + $0x1a8] sm:$0xff]  ;;  %v82_v6 = vld [vmem:[%s1789_s1 + $0x198] sm:$0xff] }
  0x18   :  { %155 = vmatprep.subr.mxu0 %v44_v34  ;;  %245 = vmatpush1.msra.mxu1 %v45_v35  ;;  %v80_v7 = vld [vmem:[%s1789_s1 + $0x188] sm:$0xff]  ;;  %v81_v8 = vld [vmem:[%s1789_s1 + $0x190] sm:$0xff]  ;;  %v1526_v9 = vld [vmem:[%s1790_s5] sm:$0xff] }
  0x19   :  { %156 = vmatpush1.msra.mxu0 %v43_v36  ;;  %246 = vmatprep.subr.mxu1 %v1251_v0  ;;  %v24_v10 = vld [vmem:[%s1791_s0 + $0x8] sm:$0xff]  ;;  %v79_v11 = vld [vmem:[%s1789_s1 + $0x180] sm:$0xff]  ;;  %v26_v13 = vld [vmem:[%s1791_s0 + $0x18] sm:$0xff]  ;;  %v1543_v14 = vcombine.high %v1526_v9, %v1526_v9 }
  0x1a   :  { %157 = vmatprep.subr.mxu0 %v41_v37  ;;  %247 = vmatpush1.msra.mxu1 %v42_v38  ;;  %v23_v12 = vld [vmem:[%s1791_s0] sm:$0xff]  ;;  %v1550_v15 = vld [vmem:[%s1790_s5 + $0x8] sm:$0xf]  ;;  %v25_v16 = vld [vmem:[%s1791_s0 + $0x10] sm:$0xff] }
  0x1b   :  { %158 = vmatpush1.msra.mxu0 %v40_v39  ;;  %248 = vmatprep.subr.mxu1 %v1251_v0  ;;  %v28_v17 = vld [vmem:[%s1791_s0 + $0x28] sm:$0xff]  ;;  %v27_v18 = vld [vmem:[%s1791_s0 + $0x20] sm:$0xff]  ;;  %v30_v19 = vld [vmem:[%s1791_s0 + $0x38] sm:$0xff] }
  0x1c   :  { %159 = vmatprep.subr.mxu0 %v38_v40  ;;  %249 = vmatpush1.msra.mxu1 %v39_v41  ;;  %v29_v20 = vld [vmem:[%s1791_s0 + $0x30] sm:$0xff]  ;;  %v103_v24 = vld [vmem:[%s1792_s2] sm:$0x7] }
  0x1d   :  { %160 = vmatpush1.msra.mxu0 %v37_v42  ;;  %250 = vmatprep.subr.mxu1 %v1251_v0  ;;  %v116_v26 = vrot.slane %v103_v24, %v1581_v23  ;;  %v112_v29 = vrot.slane %v103_v24, %v1586_v25  ;;  %v108_v31 = vrot.slane %v103_v24, %v1589_v27 }
  0x1e   :  { %161 = vmatprep.subr.mxu0 %v35_v43  ;;  %251 = vmatpush1.msra.mxu1 %v36_v44 }
  0x1f   :  { %162 = vmatpush1.msra.mxu0 %v34_v45  ;;  %252 = vmatprep.subr.mxu1 %v1251_v0 }
  0x20   :  { %163 = vmatprep.subr.mxu0 %v32_v46  ;;  %253 = vmatpush1.msra.mxu1 %v33_v47 }
  0x21   :  { %164 = vmatpush1.msra.mxu0 %v31_v48  ;;  %270 = vmatprep.subr.mxu1 %v1251_v0 }
  0x22   :  { %181 = vmatprep.subr.mxu0 %v101_v49  ;;  %271 = vmatpush2.msra.mxu1 %v102_v50 }
  0x23   :  { %182 = vmatpush2.msra.mxu0 %v100_v51  ;;  %272 = vmatprep.subr.mxu1 %v1251_v0 }
  0x24   :  { %183 = vmatprep.subr.mxu0 %v98_v52  ;;  %273 = vmatpush2.msra.mxu1 %v99_v53 }
  0x25   :  { %184 = vmatpush2.msra.mxu0 %v97_v54  ;;  %274 = vmatprep.subr.mxu1 %v1251_v0 }
  0x26   :  { %185 = vmatprep.subr.mxu0 %v95_v55  ;;  %275 = vmatpush2.msra.mxu1 %v96_v56 }
  0x27   :  { %186 = vmatpush2.msra.mxu0 %v94_v57  ;;  %276 = vmatprep.subr.mxu1 %v1251_v0 }
  0x28   :  { %187 = vmatprep.subr.mxu0 %v92_v58  ;;  %277 = vmatpush2.msra.mxu1 %v93_v59 }
  0x29   :  { %188 = vmatpush2.msra.mxu0 %v91_v60  ;;  %278 = vmatprep.subr.mxu1 %v1251_v0 }
  0x2a   :  { %189 = vmatprep.subr.mxu0 %v89_v61  ;;  %279 = vmatpush2.msra.mxu1 %v90_v62 }
  0x2b   :  { %190 = vmatpush2.msra.mxu0 %v88_v63  ;;  %280 = vmatprep.subr.mxu1 %v1251_v0 }
  0x2c   :  { %191 = vmatprep.subr.mxu0 %v86_v1  ;;  %281 = vmatpush2.msra.mxu1 %v87_v2 }
  0x2d   :  { %192 = vmatpush2.msra.mxu0 %v85_v3  ;;  %282 = vmatprep.subr.mxu1 %v1251_v0 }
  0x2e   :  { %193 = vmatprep.subr.mxu0 %v83_v4  ;;  %283 = vmatpush2.msra.mxu1 %v84_v5 }
  0x2f   :  { %194 = vmatpush2.msra.mxu0 %v82_v6  ;;  %284 = vmatprep.subr.mxu1 %v1251_v0 }
  0x30   :  { %195 = vmatprep.subr.mxu0 %v80_v7  ;;  %285 = vmatpush2.msra.mxu1 %v81_v8 }
  0x31   :  { %1163 = vmatprep.mubr.msk.f32.mxu1 %vm120_vm0, %v24_v10  ;;  %196 = vmatpush2.msra.mxu0 %v79_v11 }
  0x32   :  { %1159 = vmatprep.mubr.msk.f32.mxu0 %vm120_vm0, %v24_v10  ;;  %287 = vmatmul.mubr.f32.vlgmr.msra.gmra.mxu1 %v23_v12 }
  0x33   :  { %198 = vmatmul.mubr.f32.vlgmr.msra.gmra.mxu0 %v23_v12  ;;  %1164 = vmatprep.mubr.msk.f32.mxu1 %vm120_vm0, %v26_v13 }
  0x34   :  { %1160 = vmatprep.mubr.msk.f32.mxu0 %vm120_vm0, %v26_v13  ;;  %343 = vmatprep.subr.mxu0 %v1543_v14 }
  0x35   :  { %344 = vmatpush1.xpose.msra.mxu0 %v1526_v9  ;;  %1209 = vmatprep.subr.mxu1 %v1550_v15 }
  0x36   :  { %292 = vmatmul.mubr.f32.gmra.mxu1 %v25_v16  ;;  %1217 = vmatprep.subr.msk.mxu0 %vm500_vm1, %v1550_v15 }
  0x37   :  { %204 = vmatmul.mubr.f32.gmra.mxu0 %v25_v16  ;;  %1165 = vmatprep.mubr.msk.f32.mxu1 %vm120_vm0, %v28_v17 }
  0x38   :  { %1161 = vmatprep.mubr.msk.f32.mxu0 %vm120_vm0, %v28_v17  ;;  %1210 = vmatpush3.xpose.msra.mxu1 %v1550_v15 }
  0x39   :  { %1167 = vmatprep.subr.msk.mxu1 %vm500_vm1, %v1543_v14 }
  0x3a   :  { %297 = vmatmul.mubr.f32.gmra.mxu1 %v27_v18 }
  0x3b   :  { %210 = vmatmul.mubr.f32.gmra.mxu0 %v27_v18  ;;  %1166 = vmatprep.mubr.msk.f32.mxu1 %vm120_vm0, %v30_v19 }
  0x3c   :  { %1162 = vmatprep.mubr.msk.f32.mxu0 %vm120_vm0, %v30_v19 }
  0x3e   :  { %302 = vmatmul.mubr.f32.gmra.mxu1 %v29_v20 }
  0x3f   :  { %216 = vmatmul.mubr.f32.gmra.mxu0 %v29_v20 }
  0xf2   :  { %v288_v28 = vpop.f32.mrf.mxu1 }
  0xf3   :  { %v1592_v30 = vadd.f32 %v288_v28, %v116_v26  ;;  %v199_v32 = vpop.f32.mrf.mxu0 }
  0xf4   :  { %v290_v33 = vpop.f32.mrf.mxu1  ;;  %v1598_v37 = vadd.f32 %v199_v32, %v108_v31 }
  0xf5   :  { %v201_v34 = vpop.f32.mrf.mxu0  ;;  %1211 = vmatprep.mubr.f32.mxu1 %v1592_v30 }
  0xf6   :  { %v1596_v35 = vadd.f32 %v201_v34, %v112_v29  ;;  %v293_v36 = vpop.f32.mrf.mxu1 }
  0xf7   :  { %v1600_v38 = vadd.f32 %v293_v36, %v116_v26  ;;  %v205_v39 = vpop.f32.mrf.mxu0 }
  0xf8   :  { %v295_v40 = vpop.f32.mrf.mxu1  ;;  %377 = vmatprep.mubr.f32.mxu0 %v1596_v35  ;;  %v1611_v44 = vadd.f32 %v205_v39, %v108_v31 }
  0xf9   :  { %v207_v41 = vpop.f32.mrf.mxu0  ;;  %378 = vmatmul.mubr.f32.vlgmr.msra.gmra.mxu0 %v1598_v37  ;;  %1212 = vmatmul.mubr.f32.vlgmr.msra.gmra.mxu1 %v1600_v38 }
  0xfa   :  { %v1605_v42 = vadd.f32 %v207_v41, %v112_v29  ;;  %v298_v43 = vpop.f32.mrf.mxu1  ;;  %1218 = vmatpush3.msk.msra.mxu0 %vm500_vm1, %v1550_v15  ;;  %1168 = vmatpush1.msk.msra.mxu1 %vm500_vm1, %v1526_v9 }
  0xfb   :  { %v1613_v45 = vadd.f32 %v298_v43, %v116_v26  ;;  %v211_v46 = vpop.f32.mrf.mxu0  ;;  %1225 = vmatprep.subr.mxu1 %v1550_v15  ;;  %735 = vmatprep.subr.mxu0 %v1543_v14 }
  0xfc   :  { %v300_v47 = vpop.f32.mrf.mxu1  ;;  %382 = vmatprep.mubr.f32.mxu0 %v1605_v42  ;;  %v1622_v51 = vadd.f32 %v211_v46, %v108_v31 }
  0xfd   :  { %v213_v48 = vpop.f32.mrf.mxu0  ;;  %383 = vmatmul.mubr.f32.gmra.mxu0 %v1611_v44  ;;  %1214 = vmatprep.mubr.f32.mxu1 %v1613_v45 }
  0xfe   :  { %v1620_v49 = vadd.f32 %v213_v48, %v112_v29  ;;  %v303_v50 = vpop.f32.mrf.mxu1 }
  0xff   :  { %v1624_v52 = vadd.f32 %v303_v50, %v116_v26  ;;  %v217_v53 = vpop.f32.mrf.mxu0 }
 0x100   :  { %v305_v54 = vpop.f32.mrf.mxu1  ;;  %387 = vmatprep.mubr.f32.mxu0 %v1620_v49  ;;  %v1632_v57 = vadd.f32 %v217_v53, %v108_v31 }
 0x101   :  { %v219_v55 = vpop.f32.mrf.mxu0  ;;  %388 = vmatmul.mubr.f32.gmra.mxu0 %v1622_v51  ;;  %1215 = vmatmul.mubr.f32.gmra.mxu1 %v1624_v52 }
 0x102   :  { %v1629_v56 = vadd.f32 %v219_v55, %v112_v29  ;;  %571 = vmatprep.mubr.f32.mxu1 %v1251_v0 }
 0x104   :  { %392 = vmatprep.mubr.f32.mxu0 %v1629_v56 }
 0x105   :  { %393 = vmatmul.mubr.f32.gmra.mxu0 %v1632_v57 }
 0x1b9   :  { %v379_v58 = vpop.f32.mrf.mxu0  ;;  %v1213_v59 = vpop.f32.mrf.mxu1 }
 0x1bb   :  { %v381_v60 = vpop.f32.mrf.mxu0  ;;  %v464_v61 = vpop.f32.mrf.mxu1 }
 0x1bc   :  { %v465_v62 = vadd.f32 %v464_v61, %v379_v58 }
 0x1bd   :  { %v384_v63 = vpop.f32.mrf.mxu0 }
 0x1be   :  { %v483_v1 = vmul.f32 0.010416667, %v465_v62  ;;  %v470_v2 = vadd.f32 %v1213_v59, %v384_v63 }
 0x1bf   :  { %v386_v3 = vpop.f32.mrf.mxu0 }
 0x1c0   :  { %v484_v4 = vmul.f32 0.010416667, %v470_v2  ;;  %1169 = vmatmul.mubr.msk.f32.vlgmr.msra.gmra.mxu1 %vm487_vm2, %v483_v1  ;;  %1219 = vmatprep.mubr.msk.f32.mxu0 %vm487_vm2, %v483_v1 }
 0x1c1   :  { %v389_v5 = vpop.f32.mrf.mxu0  ;;  %v1216_v6 = vpop.f32.mrf.mxu1  ;;  %577 = vmatprep.mubr.f32.mxu1 %v1251_v0  ;;  %1226 = vmatpush3.xpose.msra.mxu1 %v1550_v15 }
 0x1c2   :  { %1220 = vmatmul.mubr.msk.f32.vlgmr.msra.gmra.mxu0 %vm487_vm2, %v484_v4  ;;  %1178 = vmatprep.subr.msk.mxu1 %vm500_vm1, %v1543_v14 }
 0x1c3   :  { %v391_v7 = vpop.f32.mrf.mxu0  ;;  %v474_v8 = vpop.f32.mrf.mxu1  ;;  %736 = vmatpush1.xpose.msra.mxu0 %v1526_v9 }
 0x1c4   :  { %v475_v10 = vadd.f32 %v474_v8, %v389_v5  ;;  %1170 = vmatmul.mubr.msk.f32.gmra.mxu1 %vm487_vm2, %v484_v4  ;;  %1233 = vmatprep.subr.msk.mxu0 %vm500_vm1, %v1550_v15 }
 0x1c5   :  { %v394_v11 = vpop.f32.mrf.mxu0  ;;  %583 = vmatprep.mubr.f32.mxu1 %v1251_v0 }
 0x1c6   :  { %v485_v12 = vmul.f32 0.010416667, %v475_v10  ;;  %v480_v13 = vadd.f32 %v1216_v6, %v394_v11 }
 0x1c7   :  { %v396_v16 = vpop.f32.mrf.mxu0 }
 0x1c8   :  { %v486_v17 = vmul.f32 0.010416667, %v480_v13  ;;  %1171 = vmatmul.mubr.msk.f32.gmra.mxu1 %vm487_vm2, %v485_v12  ;;  %1222 = vmatprep.mubr.msk.f32.mxu0 %vm487_vm2, %v485_v12 }
 0x1c9   :  { %589 = vmatprep.mubr.f32.mxu1 %v1251_v0 }
 0x1ca   :  { %1223 = vmatmul.mubr.msk.f32.gmra.mxu0 %vm487_vm2, %v486_v17 }
 0x1cc   :  { %1172 = vmatmul.mubr.msk.f32.gmra.mxu1 %vm487_vm2, %v486_v17 }
 0x280   :  { %v573_v14 = vpop.f32.mrf.mxu1 }
 0x281   :  { %v1654_v18 = vsub.f32 %v1598_v37, %v573_v14 }
 0x282   :  { %v575_v19 = vpop.f32.mrf.mxu1  ;;  %v1221_v20 = vpop.f32.mrf.mxu0 }
 0x283   :  { %v1657_v21 = vsub.f32 %v1596_v35, %v575_v19  ;;  %v1660_v22 = vsub.f32 %v1600_v38, %v1221_v20  ;;  %v693_v31 = vmul.f32 %v1654_v18, %v1654_v18 }
 0x284   :  { %v579_v24 = vpop.f32.mrf.mxu1  ;;  %v662_v26 = vpop.f32.mrf.mxu0 }
 0x285   :  { %v694_v28 = vmul.f32 %v1657_v21, %v1657_v21  ;;  %v1665_v29 = vsub.f32 %v1592_v30, %v662_v26  ;;  %v1670_v32 = vsub.f32 %v1611_v44, %v579_v24  ;;  %v698_v36 = vmul.f32 %v1660_v22, %v1660_v22  ;;  %v1085_v26 = vld [vmem:[%s1793_s3] sm:$0x7] }
 0x286   :  { %v581_v33 = vpop.f32.mrf.mxu1 }
 0x287   :  { %v695_v34 = vmul.f32 %v1665_v29, %v1665_v29  ;;  %v1675_v35 = vsub.f32 %v1605_v42, %v581_v33  ;;  %769 = vmatprep.mubr.f32.mxu0 %v694_v28  ;;  %v696_v38 = vmul.f32 %v1670_v32, %v1670_v32  ;;  %v1114_v28 = vld [vmem:[%s1794_s4] sm:$0x7] }
 0x288   :  { %v585_v37 = vpop.f32.mrf.mxu1  ;;  %770 = vmatmul.mubr.f32.vlgmr.msra.gmra.mxu0 %v693_v31  ;;  %v1090_v31 = vrot.slane %v1085_v26, %v1589_v27 }
 0x289   :  { %v697_v30 = vmul.f32 %v1675_v35, %v1675_v35  ;;  %1227 = vmatprep.mubr.f32.mxu1 %v695_v34  ;;  %1234 = vmatpush3.msk.msra.mxu0 %vm500_vm1, %v1550_v15  ;;  %v1686_v39 = vsub.f32 %v1622_v51, %v585_v37  ;;  %v1098_v34 = vrot.slane %v1085_v26, %v1581_v23 }
 0x28a   :  { %v587_v40 = vpop.f32.mrf.mxu1  ;;  %v1224_v41 = vpop.f32.mrf.mxu0  ;;  %1228 = vmatmul.mubr.f32.vlgmr.msra.gmra.mxu1 %v698_v36  ;;  %v1119_v37 = vrot.slane %v1114_v28, %v1589_v27 }
 0x28b   :  { %v1689_v42 = vsub.f32 %v1620_v49, %v587_v40  ;;  %774 = vmatprep.mubr.f32.mxu0 %v697_v30  ;;  %1179 = vmatpush1.msk.msra.mxu1 %vm500_vm1, %v1526_v9  ;;  %v1694_v43 = vsub.f32 %v1624_v52, %v1224_v41  ;;  %v699_v48 = vmul.f32 %v1686_v39, %v1686_v39 }
 0x28c   :  { %v591_v15 = vpop.f32.mrf.mxu1  ;;  %v672_v44 = vpop.f32.mrf.mxu0  ;;  %775 = vmatmul.mubr.f32.gmra.mxu0 %v696_v38  ;;  %v1094_v30 = vrot.slane %v1085_v26, %v1586_v25  ;;  %v1127_v40 = vrot.slane %v1114_v28, %v1581_v23 }
 0x28d   :  { %v700_v46 = vmul.f32 %v1689_v42, %v1689_v42  ;;  %v1699_v47 = vsub.f32 %v1613_v45, %v672_v44  ;;  %v1704_v49 = vsub.f32 %v1632_v57, %v591_v15  ;;  %v704_v52 = vmul.f32 %v1694_v43, %v1694_v43 }
 0x28e   :  { %v593_v50 = vpop.f32.mrf.mxu1 }
 0x28f   :  { %v701_v9 = vmul.f32 %v1699_v47, %v1699_v47  ;;  %v1709_v51 = vsub.f32 %v1629_v56, %v593_v50  ;;  %779 = vmatprep.mubr.f32.mxu0 %v700_v46  ;;  %v702_v53 = vmul.f32 %v1704_v49, %v1704_v49  ;;  %v1123_v46 = vrot.slane %v1114_v28, %v1586_v25 }
 0x290   :  { %780 = vmatmul.mubr.f32.gmra.mxu0 %v699_v48 }
 0x291   :  { %v703_v45 = vmul.f32 %v1709_v51, %v1709_v51  ;;  %1230 = vmatprep.mubr.f32.mxu1 %v701_v9 }
 0x292   :  { %1231 = vmatmul.mubr.f32.gmra.mxu1 %v704_v52 }
 0x293   :  { %784 = vmatprep.mubr.f32.mxu0 %v703_v45  ;;  %963 = vmatprep.mubr.f32.mxu1 %v1251_v0 }
 0x294   :  { %785 = vmatmul.mubr.f32.gmra.mxu0 %v702_v53 }
 0x348   :  { %v771_v54 = vpop.f32.mrf.mxu0 }
 0x34a   :  { %v773_v55 = vpop.f32.mrf.mxu0  ;;  %v1229_v56 = vpop.f32.mrf.mxu1 }
 0x34c   :  { %v776_v57 = vpop.f32.mrf.mxu0  ;;  %v856_v58 = vpop.f32.mrf.mxu1 }
 0x34d   :  { %v862_v59 = vadd.f32 %v1229_v56, %v776_v57  ;;  %v857_v60 = vadd.f32 %v856_v58, %v771_v54 }
 0x34e   :  { %v778_v61 = vpop.f32.mrf.mxu0 }
 0x34f   :  { %v876_v62 = vmul.f32 0.010416667, %v862_v59  ;;  %v875_v63 = vmul.f32 0.010416667, %v857_v60 }
 0x350   :  { %v781_v1 = vpop.f32.mrf.mxu0 }
 0x351   :  { %v880_v2 = vadd.f32 1e-05, %v876_v62  ;;  %v879_v3 = vadd.f32 1e-05, %v875_v63 }
 0x352   :  { %v783_v4 = vpop.f32.mrf.mxu0  ;;  %v1232_v5 = vpop.f32.mrf.mxu1 }
 0x353   :  { %1243 = vrsqrt.f32 %v880_v2 }
 0x354   :  { %1245 = vrsqrt.f32 %v879_v3  ;;  %v786_v6 = vpop.f32.mrf.mxu0  ;;  %v866_v7 = vpop.f32.mrf.mxu1 }
 0x355   :  { %v872_v8 = vadd.f32 %v1232_v5, %v786_v6  ;;  %v867_v10 = vadd.f32 %v866_v7, %v781_v1 }
 0x356   :  { %v788_v11 = vpop.f32.mrf.mxu0 }
 0x357   :  { %v878_v12 = vmul.f32 0.010416667, %v872_v8  ;;  %v877_v13 = vmul.f32 0.010416667, %v867_v10 }
 0x359   :  { %v882_v16 = vadd.f32 1e-05, %v878_v12  ;;  %v881_v17 = vadd.f32 1e-05, %v877_v13 }
 0x35b   :  { %1247 = vrsqrt.f32 %v882_v16 }
 0x35c   :  { %1249 = vrsqrt.f32 %v881_v17 }
 0x360   :  { %v1244_v14 = vpop.eup %1243 }
 0x361   :  { %v1246_v19 = vpop.eup %1245 }
 0x362   :  { %1180 = vmatmul.mubr.msk.f32.vlgmr.msra.gmra.mxu1 %vm487_vm2, %v1246_v19  ;;  %1235 = vmatprep.mubr.msk.f32.mxu0 %vm487_vm2, %v1246_v19 }
 0x363   :  { %1236 = vmatmul.mubr.msk.f32.vlgmr.msra.gmra.mxu0 %vm487_vm2, %v1244_v14  ;;  %969 = vmatprep.mubr.f32.mxu1 %v1251_v0 }
 0x366   :  { %1181 = vmatmul.mubr.msk.f32.gmra.mxu1 %vm487_vm2, %v1244_v14 }
 0x367   :  { %975 = vmatprep.mubr.f32.mxu1 %v1251_v0 }
 0x368   :  { %v1248_v20 = vpop.eup %1247 }
 0x369   :  { %v1250_v24 = vpop.eup %1249 }
 0x36a   :  { %1182 = vmatmul.mubr.msk.f32.gmra.mxu1 %vm487_vm2, %v1250_v24  ;;  %1238 = vmatprep.mubr.msk.f32.mxu0 %vm487_vm2, %v1250_v24 }
 0x36b   :  { %1239 = vmatmul.mubr.msk.f32.gmra.mxu0 %vm487_vm2, %v1248_v20  ;;  %981 = vmatprep.mubr.f32.mxu1 %v1251_v0 }
 0x36e   :  { %1183 = vmatmul.mubr.msk.f32.gmra.mxu1 %vm487_vm2, %v1248_v20 }
 0x422   :  { %v965_v33 = vpop.f32.mrf.mxu1 }
 0x423   :  { %v1073_v36 = vmul.f32 %v965_v33, %v1654_v18  ;;  %v1237_v0 = vpop.f32.mrf.mxu0 }
 0x424   :  { %v1078_v38 = vmul.f32 %v1237_v0, %v1660_v22  ;;  %v967_v41 = vpop.f32.mrf.mxu1 }
 0x425   :  { %v1102_v15 = vmul.f32 %v1090_v31, %v1073_v36  ;;  %v1074_v44 = vmul.f32 %v967_v41, %v1657_v21  ;;  %v1054_v48 = vpop.f32.mrf.mxu0 }
 0x426   :  { %v1107_v50 = vmul.f32 %v1098_v34, %v1078_v38  ;;  %v1075_v9 = vmul.f32 %v1054_v48, %v1665_v29  ;;  %v971_v18 = vpop.f32.mrf.mxu1 }
 0x427   :  { %v1131_v52 = vadd.f32 %v1119_v37, %v1102_v15  ;;  %v1103_v27 = vmul.f32 %v1094_v30, %v1074_v44  ;;  %v1076_v45 = vmul.f32 %v971_v18, %v1670_v32 }
 0x428   :  { %v1136_v53 = vadd.f32 %v1127_v40, %v1107_v50  ;;  %v1104_v54 = vmul.f32 %v1098_v34, %v1075_v9  ;;  %v973_v22 = vpop.f32.mrf.mxu1 }
 0x429   :  { %1143 = vst [vmem:[%s1795_s6] sm:$0xff] %v1131_v52  ;;  %v1132_v23 = vadd.f32 %v1123_v46, %v1103_v27  ;;  %v1105_v21 = vmul.f32 %v1090_v31, %v1076_v45  ;;  %v1077_v25 = vmul.f32 %v973_v22, %v1675_v35 }
 0x42a   :  { %1148 = vst [vmem:[%s1795_s6 + $0x28] sm:$0xff] %v1136_v53  ;;  %v1133_v29 = vadd.f32 %v1127_v40, %v1104_v54  ;;  %v977_v55 = vpop.f32.mrf.mxu1 }
 0x42b   :  { %1144 = vst [vmem:[%s1795_s6 + $0x8] sm:$0xff] %v1132_v23  ;;  %v1134_v32 = vadd.f32 %v1119_v37, %v1105_v21  ;;  %v1106_v56 = vmul.f32 %v1094_v30, %v1077_v25  ;;  %v1079_v57 = vmul.f32 %v977_v55, %v1686_v39  ;;  %v1240_v58 = vpop.f32.mrf.mxu0 }
 0x42c   :  { %1145 = vst [vmem:[%s1795_s6 + $0x10] sm:$0xff] %v1133_v29  ;;  %v1084_v35 = vmul.f32 %v1240_v58, %v1694_v43  ;;  %v979_v59 = vpop.f32.mrf.mxu1 }
 0x42d   :  { %1146 = vst [vmem:[%s1795_s6 + $0x18] sm:$0xff] %v1134_v32  ;;  %v1135_v60 = vadd.f32 %v1123_v46, %v1106_v56  ;;  %v1108_v61 = vmul.f32 %v1090_v31, %v1079_v57  ;;  %v1080_v62 = vmul.f32 %v979_v59, %v1689_v42  ;;  %v1064_v63 = vpop.f32.mrf.mxu0 }
 0x42e   :  { %v1113_v1 = vmul.f32 %v1098_v34, %v1084_v35  ;;  %v1081_v39 = vmul.f32 %v1064_v63, %v1699_v47  ;;  %v983_v2 = vpop.f32.mrf.mxu1 }
 0x42f   :  { %1147 = vst [vmem:[%s1795_s6 + $0x20] sm:$0xff] %v1135_v60  ;;  %v1137_v3 = vadd.f32 %v1119_v37, %v1108_v61  ;;  %v1109_v43 = vmul.f32 %v1094_v30, %v1080_v62  ;;  %v1082_v4 = vmul.f32 %v983_v2, %v1704_v49 }
 0x430   :  { %v1142_v5 = vadd.f32 %v1127_v40, %v1113_v1  ;;  %v1110_v6 = vmul.f32 %v1098_v34, %v1081_v39  ;;  %v985_v7 = vpop.f32.mrf.mxu1 }
 0x431   :  { %1149 = vst [vmem:[%s1795_s6 + $0x30] sm:$0xff] %v1137_v3  ;;  %v1138_v42 = vadd.f32 %v1123_v46, %v1109_v43  ;;  %v1111_v8 = vmul.f32 %v1090_v31, %v1082_v4  ;;  %v1083_v47 = vmul.f32 %v985_v7, %v1709_v51 }
 0x432   :  { %1154 = vst [vmem:[%s1795_s6 + $0x58] sm:$0xff] %v1142_v5  ;;  %v1139_v10 = vadd.f32 %v1127_v40, %v1110_v6 }
 0x433   :  { %1150 = vst [vmem:[%s1795_s6 + $0x38] sm:$0xff] %v1138_v42  ;;  %v1140_v49 = vadd.f32 %v1119_v37, %v1111_v8  ;;  %v1112_v11 = vmul.f32 %v1094_v30, %v1083_v47 }
 0x434   :  { %1151 = vst [vmem:[%s1795_s6 + $0x40] sm:$0xff] %v1139_v10 }
 0x435   :  { %1152 = vst [vmem:[%s1795_s6 + $0x48] sm:$0xff] %v1140_v49  ;;  %v1141_v51 = vadd.f32 %v1123_v46, %v1112_v11 }
 0x437   :  { %1153 = vst [vmem:[%s1795_s6 + $0x50] sm:$0xff] %v1141_v51 }

</bundles_post_ra>
